<compile_context>
chip_gen: v5e
topology: v5e:2x2
jax: 0.10.0
libtpu: 0.0.40
codegen_flags: <defaults>
</compile_context>

<pallas_src>
import functools
import math

import jax
import jax.numpy as jnp
from jax.experimental import pallas as pl
from jax.experimental.pallas import tpu as pltpu


# ---------------------------------------------------------------------------
# VMEM budget: 3/4 of physical, capped at 96 MiB.
#   v5e / v6e (128 MiB physical) -> 96 MiB ; v7x (64 MiB) -> 48 MiB.
# ---------------------------------------------------------------------------
_VMEM_LIMIT = None


def _vmem_limit_bytes():
    global _VMEM_LIMIT
    if _VMEM_LIMIT is None:
        cap = 64 * 1024 * 1024  # conservative fallback, safe on every gen
        try:
            cap = int(pltpu.get_tpu_info().vmem_capacity_bytes)
        except Exception:
            pass
        _VMEM_LIMIT = min((cap * 3) // 4, 96 * 1024 * 1024)
    return _VMEM_LIMIT


def _pick_tile(dim, target, align):
    """Largest exact-divisor tile <= target that is a multiple of `align`;
    falls back to the full dim (full-extent blocks are always legal)."""
    if dim <= target:
        return dim
    t = (target // align) * align
    while t >= align:
        if dim % t == 0:
            return t
        t -= align
    return dim


def _row_tile(m, target):
    """Row (sublane-dim) tile.  Full dim if small, otherwise the fixed target
    with a pl.cdiv grid — avoids tile collapse for prime row counts (L=197)."""
    return m if m <= target else target


# ---------------------------------------------------------------------------
# exact GELU (erf via Abramowitz-Stegun 7.1.26, max abs err ~1.5e-7)
# built only from mul/add/div/exp/where so it always lowers in Mosaic.
# ---------------------------------------------------------------------------
def _erf_approx(x):
    a1, a2, a3, a4, a5 = (0.254829592, -0.284496736, 1.421413741,
                          -1.453152027, 1.061405429)
    p = 0.3275911
    ax = jnp.where(x < 0.0, -x, x)
    t = 1.0 / (1.0 + p * ax)
    poly = ((((a5 * t + a4) * t + a3) * t + a2) * t + a1) * t
    y = 1.0 - poly * jnp.exp(-ax * ax)
    return jnp.where(x < 0.0, -y, y)


def _gelu_exact(x):
    return 0.5 * x * (1.0 + _erf_approx(x * 0.7071067811865476))


# ---------------------------------------------------------------------------
# Kernel 1: row-wise LayerNorm on (M, C)
# ---------------------------------------------------------------------------
def _layernorm_kernel(x_ref, g_ref, b_ref, o_ref, *, eps):
    x = x_ref[...].astype(jnp.float32)
    mu = jnp.mean(x, axis=-1, keepdims=True)
    xc = x - mu
    var = jnp.mean(xc * xc, axis=-1, keepdims=True)
    y = xc * jax.lax.rsqrt(var + eps)
    y = y * g_ref[...].astype(jnp.float32) + b_ref[...].astype(jnp.float32)
    o_ref[...] = y.astype(o_ref.dtype)


def pallas_layernorm(x2d, gamma, beta, eps=1e-5):
    M, C = x2d.shape
    tm = _row_tile(M, 512)
    return pl.pallas_call(
        functools.partial(_layernorm_kernel, eps=eps),
        out_shape=jax.ShapeDtypeStruct((M, C), x2d.dtype),
        grid=(pl.cdiv(M, tm),),
        in_specs=[
            pl.BlockSpec((tm, C), lambda i: (i, 0)),
            pl.BlockSpec((1, C), lambda i: (0, 0)),
            pl.BlockSpec((1, C), lambda i: (0, 0)),
        ],
        out_specs=pl.BlockSpec((tm, C), lambda i: (i, 0)),
        compiler_params=pltpu.CompilerParams(
            dimension_semantics=("parallel",),
            vmem_limit_bytes=_vmem_limit_bytes()),
    )(x2d, gamma.reshape(1, C), beta.reshape(1, C))


# ---------------------------------------------------------------------------
# Kernel 2: tiled linear  y = x @ W_t + b  [+ activation | + residual]
# grid = (cdiv(M,tm), N//tn, K//tk), f32 VMEM accumulator, pl.when init/final.
# ---------------------------------------------------------------------------
def _linear_kernel(x_ref, w_ref, b_ref, o_ref, acc_ref, *, activation):
    k = pl.program_id(2)

    @pl.when(k == 0)
    def _():
        acc_ref[...] = jnp.zeros_like(acc_ref)

    acc_ref[...] += jnp.dot(x_ref[...], w_ref[...],
                            preferred_element_type=jnp.float32)

    @pl.when(k == pl.num_programs(2) - 1)
    def _():
        y = acc_ref[...] + b_ref[...].astype(jnp.float32)
        if activation is not None:
            y = activation(y)
        o_ref[...] = y.astype(o_ref.dtype)


def _linear_residual_kernel(x_ref, w_ref, b_ref, r_ref, o_ref, acc_ref):
    k = pl.program_id(2)

    @pl.when(k == 0)
    def _():
        acc_ref[...] = jnp.zeros_like(acc_ref)

    acc_ref[...] += jnp.dot(x_ref[...], w_ref[...],
                            preferred_element_type=jnp.float32)

    @pl.when(k == pl.num_programs(2) - 1)
    def _():
        y = (acc_ref[...] + b_ref[...].astype(jnp.float32)
             + r_ref[...].astype(jnp.float32))
        o_ref[...] = y.astype(o_ref.dtype)


def pallas_linear(x2d, w_t, b, *, activation=None, residual=None,
                  tm=512, tn=512, tk=512):
    """x2d: (M, K), w_t: (K, Nout) (pre-transposed once), b: (Nout,).
    If residual is given (M, Nout), it is added in the epilogue (fused skip)."""
    M, K = x2d.shape
    Nout = w_t.shape[1]
    tm = _row_tile(M, tm)            # ragged last block handled by cdiv grid
    tn = _pick_tile(Nout, tn, 128)   # lane-aligned, exact divisor
    tk = _pick_tile(K, tk, 128)      # K must divide exactly (accumulation)
    grid = (pl.cdiv(M, tm), Nout // tn, K // tk)

    b2d = b.reshape(1, Nout)
    x_spec = pl.BlockSpec((tm, tk), lambda i, j, k: (i, k))
    w_spec = pl.BlockSpec((tk, tn), lambda i, j, k: (k, j))
    b_spec = pl.BlockSpec((1, tn), lambda i, j, k: (0, j))
    o_spec = pl.BlockSpec((tm, tn), lambda i, j, k: (i, j))
    cparams = pltpu.CompilerParams(
        dimension_semantics=("parallel", "parallel", "arbitrary"),
        vmem_limit_bytes=_vmem_limit_bytes())
    scratch = [pltpu.VMEM((tm, tn), jnp.float32)]
    out_shape = jax.ShapeDtypeStruct((M, Nout), x2d.dtype)

    if residual is None:
        kernel = functools.partial(_linear_kernel, activation=activation)
        return pl.pallas_call(
            kernel, out_shape=out_shape, grid=grid,
            in_specs=[x_spec, w_spec, b_spec],
            out_specs=o_spec, scratch_shapes=scratch,
            compiler_params=cparams,
        )(x2d, w_t, b2d)

    assert activation is None
    r_spec = pl.BlockSpec((tm, tn), lambda i, j, k: (i, j))
    return pl.pallas_call(
        _linear_residual_kernel, out_shape=out_shape, grid=grid,
        in_specs=[x_spec, w_spec, b_spec, r_spec],
        out_specs=o_spec, scratch_shapes=scratch,
        compiler_params=cparams,
    )(x2d, w_t, b2d, residual)


# ---------------------------------------------------------------------------
# Kernel 3: multi-head SDPA.
#   Aligned path:  grid=(N, head_groups), lane-aligned (1, L, W) q/k/v blocks
#                  (W multiple of 128), one lane-dense (1, L, W) output store.
#   Fallback path: grid=(N,), whole (1, L, 3C) block, one (1, L, C) store.
# Matmuls run in the model dtype (bf16 native on MXU) with f32 accumulation;
# scale is applied to the f32 scores.
# ---------------------------------------------------------------------------
def _softmax_rows(s):
    s = s - jnp.max(s, axis=-1, keepdims=True)
    p = jnp.exp(s)
    denom = jnp.sum(p, axis=-1, keepdims=True)
    r = pl.reciprocal(denom, approx=True)   # EUP estimate...
    r = r * (2.0 - denom * r)               # ...+ one Newton step (f32 accurate)
    return p * r


def _sdpa_one_head(q, k, v, scale, mask):
    s = jax.lax.dot_general(q, k, (((1,), (1,)), ((), ())),
                            preferred_element_type=jnp.float32)   # (L, L) f32
    s = s * scale
    if mask is not None:
        s = s + mask
    p = _softmax_rows(s)
    return jnp.dot(p.astype(v.dtype), v, preferred_element_type=jnp.float32)


def _mha_group_kernel(*refs, heads, scale, has_mask):
    if has_mask:
        q_ref, k_ref, v_ref, m_ref, o_ref = refs
        mask = m_ref[...].astype(jnp.float32)
    else:
        q_ref, k_ref, v_ref, o_ref = refs
        mask = None
    W = q_ref.shape[-1]
    D = W // heads
    outs = []
    for h in range(heads):
        sl = slice(h * D, (h + 1) * D)
        outs.append(_sdpa_one_head(q_ref[0, :, sl], k_ref[0, :, sl],
                                   v_ref[0, :, sl], scale, mask))
    o = outs[0] if heads == 1 else jnp.concatenate(outs, axis=-1)
    o_ref[0] = o.astype(o_ref.dtype)        # single lane-dense store


def _mha_full_kernel(*refs, num_heads, scale, has_mask):
    if has_mask:
        qkv_ref, m_ref, o_ref = refs
        mask = m_ref[...].astype(jnp.float32)
    else:
        qkv_ref, o_ref = refs
        mask = None
    C = qkv_ref.shape[-1] // 3
    D = C // num_heads
    outs = []
    for h in range(num_heads):
        q = qkv_ref[0, :, h * D:(h + 1) * D]
        k = qkv_ref[0, :, C + h * D:C + (h + 1) * D]
        v = qkv_ref[0, :, 2 * C + h * D:2 * C + (h + 1) * D]
        outs.append(_sdpa_one_head(q, k, v, scale, mask))
    o = outs[0] if num_heads == 1 else jnp.concatenate(outs, axis=-1)
    o_ref[0] = o.astype(o_ref.dtype)        # single lane-dense store


def pallas_mha(qkv, num_heads, scale, attn_mask=None):
    """qkv: (N, L, 3C) in torch in_proj order [q|k|v]; returns context (N, L, C).
    TODO(synk): query-tiled online-softmax variant for very long L."""
    N, L, C3 = qkv.shape
    C = C3 // 3
    H = num_heads
    D = C // H
    has_mask = attn_mask is not None
    out_shape = jax.ShapeDtypeStruct((N, L, C), qkv.dtype)
    cparams2 = pltpu.CompilerParams(
        dimension_semantics=("parallel", "parallel"),
        vmem_limit_bytes=_vmem_limit_bytes())
    cparams1 = pltpu.CompilerParams(
        dimension_semantics=("parallel",),
        vmem_limit_bytes=_vmem_limit_bytes())

    # group width W: smallest multiple of D that is a multiple of 128 and
    # divides C (e.g. D=64 -> W=128, 2 heads per group).
    W = D * 128 // math.gcd(D, 128)
    if W <= C and C % W == 0 and W // D <= 8:
        hpg = W // D
        G = C // W
        nq = C // W  # number of W-blocks per q/k/v section
        kernel = functools.partial(_mha_group_kernel, heads=hpg, scale=scale,
                                   has_mask=has_mask)
        in_specs = [
            pl.BlockSpec((1, L, W), lambda n, g: (n, 0, g)),
            pl.BlockSpec((1, L, W), lambda n, g: (n, 0, nq + g)),
            pl.BlockSpec((1, L, W), lambda n, g: (n, 0, 2 * nq + g)),
        ]
        args = [qkv, qkv, qkv]
        if has_mask:
            in_specs.append(pl.BlockSpec((L, L), lambda n, g: (0, 0)))
            args.append(attn_mask)
        return pl.pallas_call(
            kernel, out_shape=out_shape, grid=(N, G),
            in_specs=in_specs,
            out_specs=pl.BlockSpec((1, L, W), lambda n, g: (n, 0, g)),
            compiler_params=cparams2,
        )(*args)

    # fallback: small / lane-unaligned head dims — whole qkv block per batch.
    kernel = functools.partial(_mha_full_kernel, num_heads=H, scale=scale,
                               has_mask=has_mask)
    in_specs = [pl.BlockSpec((1, L, C3), lambda n: (n, 0, 0))]
    args = [qkv]
    if has_mask:
        in_specs.append(pl.BlockSpec((L, L), lambda n: (0, 0)))
        args.append(attn_mask)
    return pl.pallas_call(
        kernel, out_shape=out_shape, grid=(N,),
        in_specs=in_specs,
        out_specs=pl.BlockSpec((1, L, C), lambda n: (n, 0, 0)),
        compiler_params=cparams1,
    )(*args)


# ---------------------------------------------------------------------------
# Full ResidualAttentionBlock forward
# ---------------------------------------------------------------------------
def _prep_mask(attn_mask):
    if attn_mask is None:
        return None
    if attn_mask.dtype == jnp.bool_:
        # True = masked.  Large finite negative so fully-masked rows stay finite.
        return jnp.where(attn_mask, -1e30, 0.0).astype(jnp.float32)
    # clamp -inf in additive masks (0 * inf -> NaN protection)
    return jnp.maximum(attn_mask.astype(jnp.float32), -1e30)


def prepare_params(params):
    """One-time prep: pre-transpose the torch (Nout, K) weights to (K, Nout)
    so no weight transposes are materialized inside the jitted forward."""
    p = dict(params)
    for name in ("in_proj_weight", "out_proj_weight",
                 "c_fc_weight", "c_proj_weight"):
        p[name + "_t"] = jnp.asarray(params[name]).T
    return p


def residual_attention_block_forward(x, params, num_heads, attn_mask=None,
                                     ln_eps=1e-5):
    """x: (L, N, C) as in the PyTorch module.  Self-attention path.
    `params` must come from prepare_params (contains *_weight_t).
    TODO(synk): cross-attention path (ln_1_kv, k_x/v_x) not implemented.
    TODO(synk): LayerScale (ls_1/ls_2) is nn.Identity for ls_init_value=None."""
    L, N, C = x.shape
    H = num_heads
    D = C // H
    scale = float(D) ** -0.5
    mask = _prep_mask(attn_mask)

    # batch-major rows so attention reads contiguous per-batch blocks
    xb = jnp.transpose(x, (1, 0, 2)).reshape(N * L, C)

    # ---- attention branch: ln_1 -> in_proj -> SDPA -> out_proj + residual ----
    h1 = pallas_layernorm(xb, params["ln_1_weight"], params["ln_1_bias"], ln_eps)
    qkv = pallas_linear(h1, params["in_proj_weight_t"], params["in_proj_bias"])
    ctx = pallas_mha(qkv.reshape(N, L, 3 * C), H, scale, mask)
    x1 = pallas_linear(ctx.reshape(N * L, C),
                       params["out_proj_weight_t"], params["out_proj_bias"],
                       residual=xb)

    # ---- MLP branch: ln_2 -> c_fc + GELU -> c_proj + residual ----
    h2 = pallas_layernorm(x1, params["ln_2_weight"], params["ln_2_bias"], ln_eps)
    hmid = pallas_linear(h2, params["c_fc_weight_t"], params["c_fc_bias"],
                         activation=_gelu_exact)
    x2 = pallas_linear(hmid, params["c_proj_weight_t"], params["c_proj_bias"],
                       residual=x1)

    return jnp.transpose(x2.reshape(N, L, C), (1, 0, 2))


# ---------------------------------------------------------------------------
# Pure-JAX reference (mirrors the PyTorch forward) for correctness checking
# ---------------------------------------------------------------------------
def residual_attention_block_reference(x, params, num_heads, attn_mask=None,
                                       ln_eps=1e-5):
    L, N, C = x.shape
    H = num_heads
    D = C // H
    scale = D ** (-0.5)
    HI = jax.lax.Precision.HIGHEST

    def layernorm(v, g, b):
        mu = jnp.mean(v, axis=-1, keepdims=True)
        var = jnp.mean((v - mu) ** 2, axis=-1, keepdims=True)
        return (v - mu) / jnp.sqrt(var + ln_eps) * g + b

    def attention(v):
        y = jnp.dot(v, params["in_proj_weight"].T, precision=HI) + params["in_proj_bias"]
        q, k, vv = jnp.split(y, 3, axis=-1)
        q = jnp.transpose(q.reshape(L, N * H, D), (1, 0, 2)) * scale
        k = jnp.transpose(k.reshape(L, N * H, D), (1, 0, 2))
        vv = jnp.transpose(vv.reshape(L, N * H, D), (1, 0, 2))
        s = jnp.einsum("bld,bmd->blm", q, k, precision=HI)
        if attn_mask is not None:
            m = attn_mask
            if m.dtype == jnp.bool_:
                m = jnp.where(m, -1e30, 0.0)
            s = s + m
        p = jax.nn.softmax(s, axis=-1)
        o = jnp.einsum("blm,bmd->bld", p, vv, precision=HI)
        o = jnp.transpose(o, (1, 0, 2)).reshape(L, N, C)
        return jnp.dot(o, params["out_proj_weight"].T, precision=HI) + params["out_proj_bias"]

    h = x + attention(layernorm(x, params["ln_1_weight"], params["ln_1_bias"]))
    m = layernorm(h, params["ln_2_weight"], params["ln_2_bias"])
    m = jnp.dot(m, params["c_fc_weight"].T, precision=HI) + params["c_fc_bias"]
    m = jax.nn.gelu(m, approximate=False)
    m = jnp.dot(m, params["c_proj_weight"].T, precision=HI) + params["c_proj_bias"]
    return h + m


if __name__ == "__main__":
    def make_params(key, C, MLP):
        ks = jax.random.split(key, 8)
        return {
            "ln_1_weight": jnp.ones((C,), jnp.float32)
                           + 0.05 * jax.random.normal(ks[0], (C,), jnp.float32),
            "ln_1_bias": 0.05 * jax.random.normal(ks[1], (C,), jnp.float32),
            "in_proj_weight": jax.random.normal(ks[2], (3 * C, C), jnp.float32) * (C ** -0.5),
            "in_proj_bias": 0.02 * jax.random.normal(ks[3], (3 * C,), jnp.float32),
            "out_proj_weight": jax.random.normal(ks[4], (C, C), jnp.float32) * (C ** -0.5),
            "out_proj_bias": jnp.zeros((C,), jnp.float32),
            "ln_2_weight": jnp.ones((C,), jnp.float32),
            "ln_2_bias": jnp.zeros((C,), jnp.float32),
            "c_fc_weight": jax.random.normal(ks[5], (MLP, C), jnp.float32) * (C ** -0.5),
            "c_fc_bias": 0.02 * jax.random.normal(ks[6], (MLP,), jnp.float32),
            "c_proj_weight": jax.random.normal(ks[7], (C, MLP), jnp.float32) * (MLP ** -0.5),
            "c_proj_bias": jnp.zeros((C,), jnp.float32),
        }

    key = jax.random.PRNGKey(0)
    kx1, kp1, kx2, kp2 = jax.random.split(key, 4)

    # 1) small module shapes (fallback SDPA path): L=8, N=2, C=32, H=4, MLP=128
    L, N, C, H = 8, 2, 32, 4
    x = jax.random.normal(kx1, (L, N, C), jnp.float32)
    params = make_params(kp1, C, 4 * C)
    pparams = prepare_params(params)

    out = jax.block_until_ready(
        residual_attention_block_forward(x, pparams, num_heads=H))
    ref = residual_attention_block_reference(x, params, num_heads=H)
    assert out.shape == (L, N, C)
    assert jnp.allclose(out, ref, atol=1e-3, rtol=1e-3), "mismatch (no mask)"

    # 2) additive causal mask path (CLIP text-tower style)
    causal = jnp.where(jnp.triu(jnp.ones((L, L), dtype=jnp.bool_), k=1),
                       -jnp.inf, 0.0).astype(jnp.float32)
    out_m = jax.block_until_ready(
        residual_attention_block_forward(x, pparams, num_heads=H, attn_mask=causal))
    ref_m = residual_attention_block_reference(x, params, num_heads=H, attn_mask=causal)
    assert jnp.allclose(out_m, ref_m, atol=1e-3, rtol=1e-3), "mismatch (causal)"

    # 3) lane-aligned head-group SDPA path: C=128, H=2 (D=64 -> 2 heads/group)
    L2, N2, C2, H2 = 8, 2, 128, 2
    x2 = jax.random.normal(kx2, (L2, N2, C2), jnp.float32)
    params2 = make_params(kp2, C2, 4 * C2)
    pparams2 = prepare_params(params2)
    out2 = jax.block_until_ready(
        residual_attention_block_forward(x2, pparams2, num_heads=H2))
    ref2 = residual_attention_block_reference(x2, params2, num_heads=H2)
    assert out2.shape == (L2, N2, C2)
    assert jnp.allclose(out2, ref2, atol=1e-3, rtol=1e-3), "mismatch (aligned path)"

    print("KERNEL_OK")
</pallas_src>

<mosaic_0001>
module attributes {stable_mosaic.version = 11 : i64} {
  func.func @_layernorm_kernel(%arg0: i32, %arg1: memref<16x32xf32, #tpu.memory_space<vmem>>, %arg2: memref<1x32xf32, #tpu.memory_space<vmem>>, %arg3: memref<1x32xf32, #tpu.memory_space<vmem>>, %arg4: memref<16x32xf32, #tpu.memory_space<vmem>>) attributes {dimension_semantics = [#tpu.dimension_semantics<parallel>], iteration_bounds = array<i64: 1>, scalar_prefetch = 0 : i64, scratch_operands = 0 : i64, tpu.core_type = #tpu.core_type<tc>, window_params = [{transform_indices = @transform_0, window_bounds = array<i64: 16, 32>}, {pipeline_mode = #tpu.pipeline_mode<synchronous>, transform_indices = @transform_1, window_bounds = array<i64: 1, 32>}, {pipeline_mode = #tpu.pipeline_mode<synchronous>, transform_indices = @transform_2, window_bounds = array<i64: 1, 32>}, {transform_indices = @transform_3, window_bounds = array<i64: 16, 32>}]} {
    %c0 = arith.constant 0 : index
    %c0_0 = arith.constant 0 : index
    %0 = vector.load %arg1[%c0, %c0_0] : memref<16x32xf32, #tpu.memory_space<vmem>>, vector<16x32xf32>
    %cst = arith.constant dense<0.000000e+00> : vector<16xf32>
    %1 = vector.multi_reduction <add>, %0, %cst [1] : vector<16x32xf32> to vector<16xf32>
    %2 = vector.shape_cast %1 : vector<16xf32> to vector<16x1xf32>
    %cst_1 = arith.constant 3.200000e+01 : f32
    %3 = vector.broadcast %cst_1 : f32 to vector<16x1xf32>
    %4 = arith.divf %2, %3 : vector<16x1xf32>
    %5 = vector.broadcast %4 : vector<16x1xf32> to vector<16x32xf32>
    %6 = arith.subf %0, %5 : vector<16x32xf32>
    %7 = arith.mulf %6, %6 : vector<16x32xf32>
    %cst_2 = arith.constant dense<0.000000e+00> : vector<16xf32>
    %8 = vector.multi_reduction <add>, %7, %cst_2 [1] : vector<16x32xf32> to vector<16xf32>
    %9 = vector.shape_cast %8 : vector<16xf32> to vector<16x1xf32>
    %cst_3 = arith.constant 3.200000e+01 : f32
    %10 = vector.broadcast %cst_3 : f32 to vector<16x1xf32>
    %11 = arith.divf %9, %10 : vector<16x1xf32>
    %cst_4 = arith.constant 9.99999974E-6 : f32
    %12 = vector.broadcast %cst_4 : f32 to vector<16x1xf32>
    %13 = arith.addf %11, %12 : vector<16x1xf32>
    %14 = math.rsqrt %13 : vector<16x1xf32>
    %15 = vector.broadcast %14 : vector<16x1xf32> to vector<16x32xf32>
    %16 = arith.mulf %6, %15 : vector<16x32xf32>
    %c0_5 = arith.constant 0 : index
    %c0_6 = arith.constant 0 : index
    %17 = vector.load %arg2[%c0_5, %c0_6] : memref<1x32xf32, #tpu.memory_space<vmem>>, vector<1x32xf32>
    %18 = vector.broadcast %17 : vector<1x32xf32> to vector<16x32xf32>
    %19 = arith.mulf %16, %18 : vector<16x32xf32>
    %c0_7 = arith.constant 0 : index
    %c0_8 = arith.constant 0 : index
    %20 = vector.load %arg3[%c0_7, %c0_8] : memref<1x32xf32, #tpu.memory_space<vmem>>, vector<1x32xf32>
    %21 = vector.broadcast %20 : vector<1x32xf32> to vector<16x32xf32>
    %22 = arith.addf %19, %21 : vector<16x32xf32>
    %c0_9 = arith.constant 0 : index
    %c0_10 = arith.constant 0 : index
    %23 = vector.load %arg4[%c0_9, %c0_10] : memref<16x32xf32, #tpu.memory_space<vmem>>, vector<16x32xf32>
    tpu.vector_store %arg4[%c0_9, %c0_10], %22 {strides = array<i32>} : memref<16x32xf32, #tpu.memory_space<vmem>>, vector<16x32xf32>,
    return
  }
  func.func @transform_0(%arg0: i32) -> (i32, i32) {
    %c0_i32 = arith.constant 0 : i32
    %c0_i32_0 = arith.constant 0 : i32
    return %arg0, %c0_i32 : i32, i32
  }
  func.func @transform_1(%arg0: i32) -> (i32, i32) {
    %c0_i32 = arith.constant 0 : i32
    %c0_i32_0 = arith.constant 0 : i32
    %c0_i32_1 = arith.constant 0 : i32
    return %c0_i32, %c0_i32_0 : i32, i32
  }
  func.func @transform_2(%arg0: i32) -> (i32, i32) {
    %c0_i32 = arith.constant 0 : i32
    %c0_i32_0 = arith.constant 0 : i32
    %c0_i32_1 = arith.constant 0 : i32
    return %c0_i32, %c0_i32_0 : i32, i32
  }
  func.func @transform_3(%arg0: i32) -> (i32, i32) {
    %c0_i32 = arith.constant 0 : i32
    %c0_i32_0 = arith.constant 0 : i32
    return %arg0, %c0_i32 : i32, i32
  }
}

</mosaic_0001>

<bundles_post_ra>
// kernel: tpu_custom_call.1
= control target key start
LH: loop header
LB: loop body
LE: loop exit
PB: predicated region body
PF: predicated region fallthrough
CT: control target
= control target key end

     0   :  { %8 = vsyncpa [#allocation3], 0  ;;  %s275_s0 = inlined_call_operand.hbm [shape: f32[16,32], index: 0, kind: input, shape index: {}]   ;;  %s276_s1 = inlined_call_operand.hbm [shape: f32[1,32], index: 1, kind: input, shape index: {}]   ;;  %s277_s2 = inlined_call_operand.vmem [shape: f32[1,32], index: 2, kind: input, shape index: {}]   ;;  %s278_s3 = inlined_call_operand.hbm [shape: f32[16,32], index: 3, kind: output, shape index: {}]  }
   0x1   :  { %9 = vsyncpa [#allocation6], 0 }
   0x2   :  { %10 = vsyncpa [#allocation4], 0  ;;  %s15_s14 = sshll.u32 %s275_s0, 4  ;;  %s225_s15 = smov [#allocation2]   ;;  %s16_s14 = int_to_ptr.hbm [resolvable:$true] %s15_s14 }
   0x3   :  { %s17_s16 = sshll.u32 %s225_s15, 4  ;;  %s29_s19 = sshll.u32 %s276_s1, 4  ;;  %s18_s16 = int_to_ptr.vmem [resolvable:$true] %s17_s16  ;;  %s30_s19 = int_to_ptr.hbm [resolvable:$true] %s29_s19 }
   0x4   :  { %s226_s20 = smov 128   ;;  %s227_s21 = smov 8  }
   0x5   :  { %23 = dma.hbm_to_vmem [thread:$0]  %s16_s14, 256, %s18_s16, [#allocation3], %s226_s20, %s226_s20, %s227_s21  }
   0x6   :  { %s228_s22 = smov [#allocation5]  }
   0x7   :  { %s31_s23 = sshll.u32 %s228_s22, 4  ;;  %s32_s23 = int_to_ptr.vmem [resolvable:$true] %s31_s23 }
   0x8   :  { %34 = dma.hbm_to_vmem [thread:$0]  %s30_s19, 16, %s32_s23, [#allocation6]  }
   0x9   :  { %219 = dma.done.wait [#allocation3], 256  }
   0xa   :  { %220 = vsyncadd [#allocation3], 4294967040 }
   0xb   :  { %221 = dma.done.wait [#allocation6], 16  }
   0xc   :  { %222 = vsyncadd [#allocation6], 4294967280  ;;  %vm47_vm0 = vcmask 261120   ;;  %v45_v0 = vld [vmem:[#allocation2] sm:$0xff]  ;;  %v46_v2 = vld [vmem:[#allocation2 + $0x8] sm:$0xff]  ;;  %v229_v4 = vmov 32.0  }
   0xd   :  { %v48_v1 = vsel %vm47_vm0, %v45_v0, 0.0  ;;  %v51_v3 = vsel %vm47_vm0, %v46_v2, 0.0  ;;  %141 = vrcp.f32 %v229_v4  ;;  %v139_v35 = vld [vmem:[#allocation5] ss:$0 sm:$0xff]  ;;  %v140_v39 = vld [vmem:[%s277_s2] ss:$0 sm:$0xff] }
   0xe   :  { %49 = vadd.xlane.f32.xlu0 %v48_v1  ;;  %s230_s24 = smov [#allocation7]   ;;  %s119_s28 = sshll.u32 %s278_s3, 4  ;;  %s120_s28 = int_to_ptr.hbm [resolvable:$true] %s119_s28 }
   0xf   :  { %s117_s25 = sshll.u32 %s230_s24, 4  ;;  %s118_s25 = int_to_ptr.vmem [resolvable:$true] %s117_s25 }
  0x13   :  { %v142_v5 = vpop.eup %141 }
  0x14   :  { %v55_v6 = vmul.f32 32.0, %v142_v5  ;;  %vm59_vm1 = vweird.f32 %v142_v5 }
  0x16   :  { %52 = vadd.xlane.f32.xlu0 %v51_v3  ;;  %v56_v7 = vsub.f32 1.0, %v55_v6 }
  0x18   :  { %v57_v8 = vmul.f32 %v142_v5, %v56_v7 }
  0x1a   :  { %v58_v9 = vadd.f32 %v142_v5, %v57_v8 }
  0x1c   :  { %v60_v10 = vsel %vm59_vm1, %v142_v5, %v58_v9 }
  0x81   :  { %v50_v11 = vpop.xlane.xlu0 %49 }
  0x82   :  { %v61_v12 = vmul.f32 %v60_v10, %v50_v11 }
  0x84   :  { %v63_v13 = vsub.f32 %v45_v0, %v61_v12 }
  0x86   :  { %v65_v14 = vmul.f32 %v63_v13, %v63_v13 }
  0x88   :  { %v67_v15 = vsel %vm47_vm0, %v65_v14, 0.0 }
  0x89   :  { %68 = vadd.xlane.f32.xlu1 %v67_v15  ;;  %v53_v16 = vpop.xlane.xlu0 %52 }
  0x8a   :  { %v62_v17 = vmul.f32 %v60_v10, %v53_v16 }
  0x8c   :  { %v64_v18 = vsub.f32 %v46_v2, %v62_v17 }
  0x8e   :  { %v66_v19 = vmul.f32 %v64_v18, %v64_v18 }
  0x90   :  { %v70_v20 = vsel %vm47_vm0, %v66_v19, 0.0 }
  0x91   :  { %71 = vadd.xlane.f32.xlu1 %v70_v20 }
  0xfc   :  { %v69_v21 = vpop.xlane.xlu1 %68 }
  0xfd   :  { %v73_v22 = vmul.f32 %v69_v21, %v60_v10 }
  0xff   :  { %v75_v23 = vadd.f32 1e-05, %v73_v22 }
 0x101   :  { %143 = vrsqrt.f32 %v75_v23  ;;  %vm83_vm3 = vweird.f32 %v75_v23 }
 0x104   :  { %v72_v24 = vpop.xlane.xlu1 %71 }
 0x105   :  { %v74_v25 = vmul.f32 %v72_v24, %v60_v10 }
 0x107   :  { %v144_v26 = vpop.eup %143  ;;  %v76_v27 = vadd.f32 1e-05, %v74_v25 }
 0x108   :  { %v78_v28 = vmul.f32 %v144_v26, %v75_v23  ;;  %vm84_vm2 = vweird.f32 %v144_v26 }
 0x109   :  { %145 = vrsqrt.f32 %v76_v27  ;;  %vm85_vm4 = vmor %vm83_vm3, %vm84_vm2  ;;  %vm93_vm6 = vweird.f32 %v76_v27 }
 0x10a   :  { %v79_v29 = vmul.f32 %v144_v26, %v78_v28 }
 0x10c   :  { %v80_v30 = vmul.f32 0.5, %v79_v29 }
 0x10e   :  { %v81_v31 = vsub.f32 1.5, %v80_v30 }
 0x10f   :  { %v146_v32 = vpop.eup %145 }
 0x110   :  { %v82_v33 = vmul.f32 %v144_v26, %v81_v31  ;;  %v88_v34 = vmul.f32 %v146_v32, %v76_v27  ;;  %vm94_vm5 = vweird.f32 %v146_v32 }
 0x111   :  { %vm95_vm7 = vmor %vm93_vm6, %vm94_vm5 }
 0x112   :  { %v86_v36 = vsel %vm85_vm4, %v144_v26, %v82_v33  ;;  %v89_v37 = vmul.f32 %v146_v32, %v88_v34 }
 0x113   :  { %v97_v38 = vmul.f32 %v86_v36, %v63_v13 }
 0x114   :  { %v90_v40 = vmul.f32 0.5, %v89_v37 }
 0x115   :  { %v103_v41 = vmul.f32 %v139_v35, %v97_v38 }
 0x116   :  { %v91_v42 = vsub.f32 1.5, %v90_v40 }
 0x117   :  { %v109_v43 = vadd.f32 %v140_v39, %v103_v41 }
 0x118   :  { %v92_v44 = vmul.f32 %v146_v32, %v91_v42 }
 0x119   :  { %111 = vst.msk [vmem:[#allocation7] sm:$0xff] %vm47_vm0, %v109_v43 }
 0x11a   :  { %v96_v45 = vsel %vm95_vm7, %v146_v32, %v92_v44 }
 0x11b   :  { %v98_v46 = vmul.f32 %v96_v45, %v64_v18 }
 0x11d   :  { %v104_v47 = vmul.f32 %v139_v35, %v98_v46 }
 0x11f   :  { %v110_v48 = vadd.f32 %v140_v39, %v104_v47 }
 0x121   :  { %112 = vst.msk [vmem:[#allocation7 + $0x8] sm:$0xff] %vm47_vm0, %v110_v48 }
 0x122   :  { %125 = dma.vmem_to_hbm [thread:$0]  %s118_s25, 256, %s120_s28, [#allocation4], %s226_s20, %s226_s20, %s227_s21  }
 0x123   :  { %223 = dma.done.wait [#allocation4], 256  }
 0x124   :  { %224 = vsyncadd [#allocation4], 4294967040 }
 0x125   :  { %130 = vsyncpa [#allocation3], 1 }
 0x126   :  { %131 = vsyncpa [#allocation6], 1 }
 0x127   :  { %132 = vsyncpa [#allocation4], 1 }

</bundles_post_ra>
